<compile_context>
chip_gen: v6e
topology: v6e:2x2x1
jax: 0.10.0
libtpu: 0.0.40
codegen_flags: <defaults>
</compile_context>

<pallas_src>
import functools
import math

import jax
import jax.numpy as jnp
from jax.experimental import pallas as pl
from jax.experimental.pallas import tpu as pltpu


def _default_budgets():
    """(per-input tile bytes, vmem_limit_bytes); generation-aware when possible."""
    tile, limit = 4 * 1024 * 1024, 48 * 1024 * 1024       # safe for v7x (64 MiB VMEM)
    try:
        info_fn = getattr(pltpu, "get_tpu_info", None)
        if info_fn is not None:
            vmem = getattr(info_fn(), "vmem_capacity_bytes", 0) or 0
            if vmem >= 96 * 1024 * 1024:                   # v5e / v6e: 128 MiB VMEM
                tile, limit = 8 * 1024 * 1024, 64 * 1024 * 1024
    except Exception:
        pass
    return tile, limit


def _contrastive_kernel(o1_ref, o2_ref, t_ref, out_ref, acc_ref, *,
                        margin, feat_dim, fold, lanes, tm, strip, n_strips,
                        rows_valid, n_inner, needs_mask):
    # o1_ref, o2_ref: (tm, lanes) native dtype   (lanes = fold * feat_dim)
    # t_ref:          (tm, fold)  float32
    # out_ref:        (8, 128)    float32  -- one resident block per "part"
    # acc_ref:        (strip, fold) float32 VMEM scratch (lane/sublane bins)
    inner = pl.program_id(1)

    @pl.when(inner == 0)
    def _init():
        acc_ref[...] = jnp.zeros_like(acc_ref)

    # Static 0/1 block-indicator (lanes, fold): sel[j, k] = 1 iff lane j belongs
    # to packed sample k (lanes k*D .. (k+1)*D - 1).  Exactly representable in bf16.
    j = jax.lax.broadcasted_iota(jnp.int32, (lanes, fold), 0)
    k = jax.lax.broadcasted_iota(jnp.int32, (lanes, fold), 1)
    lo = k * feat_dim
    sel = jnp.where((j >= lo) & (j < lo + feat_dim), 1.0, 0.0).astype(jnp.bfloat16)

    # Logical (unclamped) row offset of this block -- used for tail masking.
    base_row = (pl.program_id(0) * n_inner + inner) * tm

    def process(s):
        r0 = s * strip
        if not isinstance(r0, int):
            r0 = pl.multiple_of(r0, strip)
        a = o1_ref[pl.ds(r0, strip), :].astype(jnp.float32)      # cast on the VPU
        b = o2_ref[pl.ds(r0, strip), :].astype(jnp.float32)
        diff = b - a
        sq = diff * diff                                         # (strip, lanes)

        # Per-sample squared distance on the MXU.  Split sq into bf16 hi/lo parts
        # so the reduction keeps ~f32 accuracy regardless of matmul precision.
        hi = sq.astype(jnp.bfloat16)
        res = (sq - hi.astype(jnp.float32)).astype(jnp.bfloat16)
        d2 = (jnp.dot(hi, sel, preferred_element_type=jnp.float32) +
              jnp.dot(res, sel, preferred_element_type=jnp.float32))   # (strip, fold)

        t = t_ref[pl.ds(r0, strip), :]                           # (strip, fold)
        hinge = jnp.maximum(margin - d2, 0.0)
        loss = 0.5 * (t * d2 + (1.0 - t) * hinge)                # (strip, fold)

        if needs_mask:
            grow = base_row + r0 + jax.lax.broadcasted_iota(
                jnp.int32, (strip, fold), 0)
            loss = jnp.where(grow < rows_valid, loss, 0.0)

        acc_ref[...] += loss                                     # VPU adds only

    if n_strips == 1:
        process(0)
    else:
        @pl.loop(0, n_strips)
        def _(s):
            process(s)

    @pl.when(inner == pl.num_programs(1) - 1)
    def _finish():
        # One reduce + one lane-dense (8,128) store per part.
        out_ref[...] = jnp.full(out_ref.shape, jnp.sum(acc_ref[...]), jnp.float32)


def contrastive_loss(output1, output2, target, margin=0.7, size_average=True,
                     tile_bytes=None, tile_rows=None):
    """Pallas TPU implementation of ContrastiveLoss.forward."""
    assert output1.shape == output2.shape and output1.ndim == 2
    B, D = output1.shape
    dtype = output1.dtype
    itemsize = jnp.dtype(dtype).itemsize
    sub = max(8, 32 // itemsize)               # sublane multiple: f32->8, bf16->16

    # ---- lane packing: fold samples per 128-lane-multiple row (free reshape) ----
    fold = 1
    if 0 < D < 128:
        f = (D * 128) // math.gcd(D, 128) // D          # lcm(D,128)//D
        if f * D <= 512 and B % f == 0:
            fold = f
    lanes = fold * D
    rows = B // fold
    rows_valid = rows

    o1 = output1.reshape(rows, lanes)                    # contiguous, no copy
    o2 = output2.reshape(rows, lanes)
    t = target.reshape(-1).astype(jnp.float32).reshape(rows, fold)

    # Tiny batches only: pad to one full sublane group (cheap; masked in-kernel).
    if rows < sub:
        pad = sub - rows
        o1 = jnp.pad(o1, ((0, pad), (0, 0)))
        o2 = jnp.pad(o2, ((0, pad), (0, 0)))
        t = jnp.pad(t, ((0, pad), (0, 0)))
        rows = sub

    # ---- generation-aware budgets & tile sizing ----
    vmem_limit = 48 * 1024 * 1024
    if tile_bytes is None:
        tile_bytes, vmem_limit = _default_budgets()
    row_bytes = lanes * itemsize

    rows_floor = (rows // sub) * sub
    lane_cap = max(sub, ((131072 // max(lanes, 1)) // sub) * sub)   # temps <= ~0.5 MiB
    strip = min(512, rows_floor, lane_cap)

    if tile_rows is not None:                             # test / tuning override
        tr = max(sub, (int(tile_rows) // sub) * sub)
        strip = min(strip, tr)
        tm = max(strip, (tr // strip) * strip)
    else:
        tm = max(strip, ((tile_bytes // row_bytes) // strip) * strip)
    tm = min(tm, (rows // strip) * strip)                 # block never exceeds array

    nblocks = -(-rows // tm)
    if nblocks == 1 and rows > strip:                     # give both v7x TCs work
        half = -(-rows // 2)
        tm = max(strip, (-(-half // strip)) * strip)
        nblocks = -(-rows // tm)

    n_parts = 2 if nblocks >= 2 else 1                    # "parallel" leading axis
    n_inner = -(-nblocks // n_parts)
    needs_mask = (n_parts * n_inner * tm != rows_valid)
    n_strips = tm // strip

    kernel = functools.partial(
        _contrastive_kernel, margin=float(margin), feat_dim=D, fold=fold,
        lanes=lanes, tm=tm, strip=strip, n_strips=n_strips,
        rows_valid=rows_valid, n_inner=n_inner, needs_mask=needs_mask)

    # Clamp out-of-range logical blocks onto the last real block; their rows are
    # >= rows_valid so the in-kernel mask zeroes their contribution.
    idx = lambda c, i: (jnp.minimum(c * n_inner + i, nblocks - 1), 0)

    flops = 3 * B * D + 8 * B
    bytes_accessed = 2 * B * D * itemsize + B * 4 + n_parts * 8 * 128 * 4

    partials = pl.pallas_call(
        kernel,
        out_shape=jax.ShapeDtypeStruct((n_parts * 8, 128), jnp.float32),
        grid_spec=pltpu.PrefetchScalarGridSpec(
            num_scalar_prefetch=0,
            grid=(n_parts, n_inner),
            in_specs=[
                pl.BlockSpec((tm, lanes), idx),
                pl.BlockSpec((tm, lanes), idx),
                pl.BlockSpec((tm, fold), idx),
            ],
            out_specs=pl.BlockSpec((8, 128), lambda c, i: (c, 0)),
            scratch_shapes=[pltpu.VMEM((strip, fold), jnp.float32)],
        ),
        compiler_params=pltpu.CompilerParams(
            dimension_semantics=("parallel", "arbitrary"),
            vmem_limit_bytes=vmem_limit,
        ),
        cost_estimate=pl.CostEstimate(flops=flops, transcendentals=0,
                                      bytes_accessed=bytes_accessed),
    )(o1, o2, t)

    # Each part's (8,128) block is filled with that part's total loss.
    total = jnp.sum(partials.reshape(n_parts, 8 * 128)[:, 0])
    return total / B if size_average else total


def _reference(output1, output2, target, margin=0.7, size_average=True):
    d = jnp.sum((output2.astype(jnp.float32) - output1.astype(jnp.float32)) ** 2, axis=1)
    t = target.astype(jnp.float32)
    losses = 0.5 * (t * d + (1.0 - t) * jnp.maximum(margin - d, 0.0))
    return jnp.mean(losses) if size_average else jnp.sum(losses)


def _check(loss, ref, tag):
    assert jnp.allclose(loss, ref, rtol=1e-4, atol=1e-4), (tag, float(loss), float(ref))


if __name__ == "__main__":
    key = jax.random.PRNGKey(0)

    # 1) Tiny batch (rows < 8 after fold=4 packing): single block, sublane pad + mask.
    k1, k2, k3 = jax.random.split(key, 3)
    B, D = 8, 32
    x1 = jax.random.normal(k1, (B, D), dtype=jnp.float32)
    x2 = jax.random.normal(k2, (B, D), dtype=jnp.float32)
    tg = jax.random.bernoulli(k3, 0.5, (B,)).astype(jnp.int32)
    loss = jax.block_until_ready(contrastive_loss(x1, x2, tg, margin=0.7))
    _check(loss, _reference(x1, x2, tg, 0.7, True), "tiny")

    # 2) Multi-part, multi-inner accumulation (fold=8, forced small tiles), sum mode.
    k1, k2, k3 = jax.random.split(jax.random.PRNGKey(1), 3)
    a1 = jax.random.normal(k1, (2048, 16), dtype=jnp.float32)
    a2 = jax.random.normal(k2, (2048, 16), dtype=jnp.float32)
    t2 = jax.random.bernoulli(k3, 0.5, (2048,)).astype(jnp.int32)
    loss2 = jax.block_until_ready(
        contrastive_loss(a1, a2, t2, margin=0.7, size_average=False, tile_rows=32))
    _check(loss2, _reference(a1, a2, t2, 0.7, False), "multi-inner")

    # 3) bf16 inputs (in-kernel f32 cast), ragged tail masked in-kernel, 2 parts.
    k1, k2, k3 = jax.random.split(jax.random.PRNGKey(2), 3)
    b1 = jax.random.normal(k1, (96, 32), dtype=jnp.bfloat16)
    b2 = jax.random.normal(k2, (96, 32), dtype=jnp.bfloat16)
    t3 = jax.random.bernoulli(k3, 0.5, (96,)).astype(jnp.int32)
    loss3 = jax.block_until_ready(
        contrastive_loss(b1, b2, t3, margin=0.7, size_average=True, tile_rows=16))
    _check(loss3, _reference(b1, b2, t3, 0.7, True), "bf16-ragged")

    # 4) fold fallback (B % fold != 0 -> fold=1, 16-lane rows) + boundary block mask.
    k1, k2, k3 = jax.random.split(jax.random.PRNGKey(3), 3)
    c1 = jax.random.normal(k1, (250, 16), dtype=jnp.float32)
    c2 = jax.random.normal(k2, (250, 16), dtype=jnp.float32)
    t4 = jax.random.bernoulli(k3, 0.5, (250,)).astype(jnp.int32)
    loss4 = jax.block_until_ready(contrastive_loss(c1, c2, t4, margin=0.7))
    _check(loss4, _reference(c1, c2, t4, 0.7, True), "fold-fallback")

    # 5) Generalized lcm packing: D=48 -> fold=8, lanes=384.
    k1, k2, k3 = jax.random.split(jax.random.PRNGKey(4), 3)
    d1 = jax.random.normal(k1, (512, 48), dtype=jnp.float32)
    d2_ = jax.random.normal(k2, (512, 48), dtype=jnp.float32)
    t5 = jax.random.bernoulli(k3, 0.5, (512,)).astype(jnp.int32)
    loss5 = jax.block_until_ready(contrastive_loss(d1, d2_, t5, margin=0.7))
    _check(loss5, _reference(d1, d2_, t5, 0.7, True), "lcm-fold")

    print("KERNEL_OK")
</pallas_src>

<mosaic_0001>
module attributes {stable_mosaic.version = 11 : i64} {
  func.func @_contrastive_kernel(%arg0: i32, %arg1: i32, %arg2: memref<8x128xf32, #tpu.memory_space<vmem>>, %arg3: memref<8x128xf32, #tpu.memory_space<vmem>>, %arg4: memref<8x4xf32, #tpu.memory_space<vmem>>, %arg5: memref<8x128xf32, #tpu.memory_space<vmem>>, %arg6: memref<8x4xf32, #tpu.memory_space<vmem>>) attributes {dimension_semantics = [#tpu.dimension_semantics<parallel>, #tpu.dimension_semantics<arbitrary>], iteration_bounds = array<i64: 1, 1>, scalar_prefetch = 0 : i64, scratch_operands = 1 : i64, tpu.core_type = #tpu.core_type<tc>, window_params = [{transform_indices = @transform_0, window_bounds = array<i64: 8, 128>}, {transform_indices = @transform_1, window_bounds = array<i64: 8, 128>}, {transform_indices = @transform_2, window_bounds = array<i64: 8, 4>}, {transform_indices = @transform_3, window_bounds = array<i64: 8, 128>}]} {
    %c0_i32 = arith.constant 0 : i32
    %0 = arith.cmpi eq, %arg1, %c0_i32 : i32
    %1 = arith.extui %0 : i1 to i32
    %c0_i32_0 = arith.constant 0 : i32
    %2 = arith.cmpi ne, %1, %c0_i32_0 : i32
    scf.if %2 {
      %cst_22 = arith.constant 0.000000e+00 : f32
      %56 = vector.broadcast %cst_22 : f32 to vector<8x4xf32>
      %c0_23 = arith.constant 0 : index
      %c0_24 = arith.constant 0 : index
      %57 = vector.load %arg6[%c0_23, %c0_24] : memref<8x4xf32, #tpu.memory_space<vmem>>, vector<8x4xf32>
      tpu.vector_store %arg6[%c0_23, %c0_24], %56 {strides = array<i32>} : memref<8x4xf32, #tpu.memory_space<vmem>>, vector<8x4xf32>,
    } else {
    }
    %3 = tpu.iota {dimensions = array<i32: 0>} : vector<128x4xi32>
    %4 = tpu.iota {dimensions = array<i32: 1>} : vector<128x4xi32>
    %c32_i32 = arith.constant 32 : i32
    %5 = vector.broadcast %c32_i32 : i32 to vector<128x4xi32>
    %6 = arith.muli %4, %5 : vector<128x4xi32>
    %7 = arith.cmpi sge, %3, %6 : vector<128x4xi32>
    %c32_i32_1 = arith.constant 32 : i32
    %8 = vector.broadcast %c32_i32_1 : i32 to vector<128x4xi32>
    %9 = arith.addi %6, %8 : vector<128x4xi32>
    %10 = arith.cmpi slt, %3, %9 : vector<128x4xi32>
    %11 = arith.andi %7, %10 : vector<128x4xi1>
    %cst = arith.constant 1.000000e+00 : f32
    %cst_2 = arith.constant 0.000000e+00 : f32
    %12 = vector.broadcast %cst : f32 to vector<128x4xf32>
    %13 = vector.broadcast %cst_2 : f32 to vector<128x4xf32>
    %14 = arith.select %11, %12, %13 : vector<128x4xi1>, vector<128x4xf32>
    %15 = arith.truncf %14 : vector<128x4xf32> to vector<128x4xbf16>
    %c1_i32 = arith.constant 1 : i32
    %16 = arith.muli %arg0, %c1_i32 : i32
    %17 = arith.addi %16, %arg1 : i32
    %c8_i32 = arith.constant 8 : i32
    %18 = arith.muli %17, %c8_i32 : i32
    %c0 = arith.constant 0 : index
    %c0_3 = arith.constant 0 : index
    %19 = vector.load %arg2[%c0, %c0_3] : memref<8x128xf32, #tpu.memory_space<vmem>>, vector<8x128xf32>
    %c0_4 = arith.constant 0 : index
    %c0_5 = arith.constant 0 : index
    %20 = vector.load %arg3[%c0_4, %c0_5] : memref<8x128xf32, #tpu.memory_space<vmem>>, vector<8x128xf32>
    %21 = arith.subf %20, %19 : vector<8x128xf32>
    %22 = arith.mulf %21, %21 : vector<8x128xf32>
    %23 = arith.truncf %22 : vector<8x128xf32> to vector<8x128xbf16>
    %24 = arith.extf %23 : vector<8x128xbf16> to vector<8x128xf32>
    %25 = arith.subf %22, %24 : vector<8x128xf32>
    %26 = arith.truncf %25 : vector<8x128xf32> to vector<8x128xbf16>
    %cst_6 = arith.constant dense<0.000000e+00> : vector<8x4xf32>
    %27 = tpu.matmul %23, %15, %cst_6 {dimension_numbers = #tpu.dot_dimension_numbers<[1], [0], [0], [1], [0, 0, 1, 1], [], []>} : vector<8x128xbf16>, vector<128x4xbf16>, vector<8x4xf32> -> vector<8x4xf32>
    %cst_7 = arith.constant dense<0.000000e+00> : vector<8x4xf32>
    %28 = tpu.matmul %26, %15, %cst_7 {dimension_numbers = #tpu.dot_dimension_numbers<[1], [0], [0], [1], [0, 0, 1, 1], [], []>} : vector<8x128xbf16>, vector<128x4xbf16>, vector<8x4xf32> -> vector<8x4xf32>
    %29 = arith.addf %27, %28 : vector<8x4xf32>
    %c0_8 = arith.constant 0 : index
    %c0_9 = arith.constant 0 : index
    %30 = vector.load %arg4[%c0_8, %c0_9] : memref<8x4xf32, #tpu.memory_space<vmem>>, vector<8x4xf32>
    %cst_10 = arith.constant 0.699999988 : f32
    %31 = vector.broadcast %cst_10 : f32 to vector<8x4xf32>
    %32 = arith.subf %31, %29 : vector<8x4xf32>
    %cst_11 = arith.constant 0.000000e+00 : f32
    %33 = vector.broadcast %cst_11 : f32 to vector<8x4xf32>
    %34 = arith.maximumf %32, %33 : vector<8x4xf32>
    %35 = arith.mulf %30, %29 : vector<8x4xf32>
    %cst_12 = arith.constant 1.000000e+00 : f32
    %36 = vector.broadcast %cst_12 : f32 to vector<8x4xf32>
    %37 = arith.subf %36, %30 : vector<8x4xf32>
    %38 = arith.mulf %37, %34 : vector<8x4xf32>
    %39 = arith.addf %35, %38 : vector<8x4xf32>
    %cst_13 = arith.constant 5.000000e-01 : f32
    %40 = vector.broadcast %cst_13 : f32 to vector<8x4xf32>
    %41 = arith.mulf %40, %39 : vector<8x4xf32>
    %c0_i32_14 = arith.constant 0 : i32
    %42 = arith.addi %18, %c0_i32_14 : i32
    %43 = tpu.iota {dimensions = array<i32: 0>} : vector<8x4xi32>
    %44 = vector.broadcast %42 : i32 to vector<8x4xi32>
    %45 = arith.addi %44, %43 : vector<8x4xi32>
    %c2_i32 = arith.constant 2 : i32
    %46 = vector.broadcast %c2_i32 : i32 to vector<8x4xi32>
    %47 = arith.cmpi slt, %45, %46 : vector<8x4xi32>
    %cst_15 = arith.constant 0.000000e+00 : f32
    %48 = vector.broadcast %cst_15 : f32 to vector<8x4xf32>
    %49 = arith.select %47, %41, %48 : vector<8x4xi1>, vector<8x4xf32>
    %c0_16 = arith.constant 0 : index
    %c0_17 = arith.constant 0 : index
    %50 = vector.load %arg6[%c0_16, %c0_17] : memref<8x4xf32, #tpu.memory_space<vmem>>, vector<8x4xf32>
    %51 = arith.addf %50, %49 : vector<8x4xf32>
    %c0_18 = arith.constant 0 : index
    %c0_19 = arith.constant 0 : index
    %52 = vector.load %arg6[%c0_18, %c0_19] : memref<8x4xf32, #tpu.memory_space<vmem>>, vector<8x4xf32>
    tpu.vector_store %arg6[%c0_18, %c0_19], %51 {strides = array<i32>} : memref<8x4xf32, #tpu.memory_space<vmem>>, vector<8x4xf32>,
    %c0_i32_20 = arith.constant 0 : i32
    %53 = arith.cmpi eq, %arg1, %c0_i32_20 : i32
    %54 = arith.extui %53 : i1 to i32
    %c0_i32_21 = arith.constant 0 : i32
    %55 = arith.cmpi ne, %54, %c0_i32_21 : i32
    scf.if %55 {
      %c0_22 = arith.constant 0 : index
      %c0_23 = arith.constant 0 : index
      %56 = vector.load %arg6[%c0_22, %c0_23] : memref<8x4xf32, #tpu.memory_space<vmem>>, vector<8x4xf32>
      %57 = vector.shape_cast %56 : vector<8x4xf32> to vector<1x8x4xf32>
      %cst_24 = arith.constant dense<0.000000e+00> : vector<1xf32>
      %58 = vector.multi_reduction <add>, %57, %cst_24 [1, 2] : vector<1x8x4xf32> to vector<1xf32>
      %59 = vector.shape_cast %58 : vector<1xf32> to vector<1x1x1xf32>
      %60 = vector.extract %59[0, 0, 0] : f32 from vector<1x1x1xf32>
      %61 = vector.broadcast %60 : f32 to vector<8x128xf32>
      %c0_25 = arith.constant 0 : index
      %c0_26 = arith.constant 0 : index
      %62 = vector.load %arg5[%c0_25, %c0_26] : memref<8x128xf32, #tpu.memory_space<vmem>>, vector<8x128xf32>
      tpu.vector_store %arg5[%c0_25, %c0_26], %61 {strides = array<i32>} : memref<8x128xf32, #tpu.memory_space<vmem>>, vector<8x128xf32>,
    } else {
    }
    return
  }
  func.func @transform_0(%arg0: i32, %arg1: i32) -> (i32, i32) {
    %c1_i32 = arith.constant 1 : i32
    %0 = arith.muli %arg0, %c1_i32 : i32
    %1 = arith.addi %0, %arg1 : i32
    %c0_i32 = arith.constant 0 : i32
    %2 = arith.minsi %1, %c0_i32 : i32
    %c0_i32_0 = arith.constant 0 : i32
    %c0_i32_1 = arith.constant 0 : i32
    return %2, %c0_i32_0 : i32, i32
  }
  func.func @transform_1(%arg0: i32, %arg1: i32) -> (i32, i32) {
    %c1_i32 = arith.constant 1 : i32
    %0 = arith.muli %arg0, %c1_i32 : i32
    %1 = arith.addi %0, %arg1 : i32
    %c0_i32 = arith.constant 0 : i32
    %2 = arith.minsi %1, %c0_i32 : i32
    %c0_i32_0 = arith.constant 0 : i32
    %c0_i32_1 = arith.constant 0 : i32
    return %2, %c0_i32_0 : i32, i32
  }
  func.func @transform_2(%arg0: i32, %arg1: i32) -> (i32, i32) {
    %c1_i32 = arith.constant 1 : i32
    %0 = arith.muli %arg0, %c1_i32 : i32
    %1 = arith.addi %0, %arg1 : i32
    %c0_i32 = arith.constant 0 : i32
    %2 = arith.minsi %1, %c0_i32 : i32
    %c0_i32_0 = arith.constant 0 : i32
    %c0_i32_1 = arith.constant 0 : i32
    return %2, %c0_i32_0 : i32, i32
  }
  func.func @transform_3(%arg0: i32, %arg1: i32) -> (i32, i32) {
    %c0_i32 = arith.constant 0 : i32
    %c0_i32_0 = arith.constant 0 : i32
    return %arg0, %c0_i32 : i32, i32
  }
}

</mosaic_0001>

<bundles_post_ra>
// kernel: tpu_custom_call.1
= control target key start
LH: loop header
LB: loop body
LE: loop exit
PB: predicated region body
PF: predicated region fallthrough
CT: control target
= control target key end

     0   :  { %8 = vsyncpa [#allocation4], 0  ;;  %s689_s0 = inlined_call_operand.vmem [shape: f32[8,128], index: 0, kind: input, shape index: {}]   ;;  %s690_s1 = inlined_call_operand.hbm [shape: f32[8,128], index: 1, kind: input, shape index: {}]   ;;  %s691_s2 = inlined_call_operand.vmem [shape: f32[8,4], index: 2, kind: input, shape index: {}]   ;;  %s692_s3 = inlined_call_operand.hbm [shape: f32[8,128], index: 3, kind: output, shape index: {}]  }
   0x1   :  { %9 = vsyncpa [#allocation5], 0  ;;  %s481_s12 = smov [#allocation3]  }
   0x2   :  { %s33_s13 = sshll.u32 %s481_s12, 4  ;;  %s34_s13 = int_to_ptr.vmem [resolvable:$true] %s33_s13 }
   0x3   :  { %s445_s14 = scalar_lea.vmem %s34_s13, 128  ;;  %p450_p1 = scmp.lt.s32.totalorder %s34_s13, %s34_s13 }
   0x4   :  { %p446_p0 = scmp.ne.s32.totalorder %s34_s13, %s445_s14  ;;  %p451_p2 = scmp.lt.s32.totalorder %s445_s14, %s445_s14 }
   0x6   :  { %p452_p3 = por %p451_p2, %p450_p1 }
   0x8   :  { %p453_p4 = pnand %p452_p3, %p446_p0 }
   0xa   :  { %456 = shalt.err (!%p453_p4)
}
   0xb   :  { %36 = dma.hbm_to_vmem [thread:$0]  %s690_s1, 128, %s34_s13, [#allocation4]   ;;  %v96_v0 = vlaneseq }
   0xc   :  { %477 = dma.done.wait [#allocation4], 128  }
   0xd   :  { %478 = vsyncadd [#allocation4], 4294967168  ;;  %v482_v1 = vmov 0.0   ;;  %v511_v2 = vshrl.u32 %v96_v0, 7  ;;  %v114_v3 = vand.u32 127, %v96_v0  ;;  %vm483_vm0 = vmmov 0  }
   0xe   :  { %390 = vmatprep.subr.bf16.mxu0 %v482_v1  ;;  %410 = vmatprep.subr.bf16.mxu1 %v482_v1  ;;  %v484_v13 = vmov 1.0|1.0   ;;  %v191_v20 = vld [vmem:[%s689_s0] sm:$0xff]  ;;  %v192_v21 = vld [vmem:[#allocation3] sm:$0xff] }
   0xf   :  { %406 = vmatprep.mubr.msk.bf16.mxu0 %vm483_vm0, %v482_v1  ;;  %426 = vmatprep.mubr.msk.bf16.mxu1 %vm483_vm0, %v482_v1  ;;  %v111_v4 = vadd.s32 112, %v511_v2  ;;  %v112_v5 = vadd.s32 120, %v511_v2  ;;  %v517_v6 = vmul.u32 32, %v114_v3  ;;  %v109_v7 = vadd.s32 96, %v511_v2  ;;  %v279_v44 = vld [vmem:[%s691_s2] sm:$0xff]  ;;  %s485_s2 = smov [#allocation6]  }
  0x10   :  { %v110_v9 = vadd.s32 104, %v511_v2  ;;  %v107_v10 = vadd.s32 80, %v511_v2  ;;  %v108_v11 = vadd.s32 88, %v511_v2  ;;  %v105_v12 = vadd.s32 64, %v511_v2  ;;  %s317_s19 = sshll.u32 %s485_s2, 4  ;;  %s318_s19 = int_to_ptr.vmem [resolvable:$true] %s317_s19 }
  0x11   :  { %vm130_vm1 = vcmp.ge.s32.totalorder %v111_v4, %v517_v6  ;;  %v522_v8 = vadd.s32 32, %v517_v6  ;;  %vm131_vm2 = vcmp.ge.s32.totalorder %v112_v5, %v517_v6  ;;  %vm128_vm6 = vcmp.ge.s32.totalorder %v109_v7, %v517_v6  ;;  %s457_s21 = scalar_lea.vmem %s318_s19, 128  ;;  %p462_p6 = scmp.lt.s32.totalorder %s318_s19, %s318_s19 }
  0x12   :  { %vm129_vm9 = vcmp.ge.s32.totalorder %v110_v9, %v517_v6  ;;  %vm126_vm13 = vcmp.ge.s32.totalorder %v107_v10, %v517_v6  ;;  %v106_v15 = vadd.s32 72, %v511_v2  ;;  %vm127_vm0 = vcmp.ge.s32.totalorder %v108_v11, %v517_v6  ;;  %p458_p5 = scmp.ne.s32.totalorder %s318_s19, %s457_s21  ;;  %p463_p7 = scmp.lt.s32.totalorder %s457_s21, %s457_s21 }
  0x13   :  { %vm147_vm3 = vcmp.lt.s32.totalorder %v111_v4, %v522_v8  ;;  %vm148_vm4 = vcmp.lt.s32.totalorder %v112_v5, %v522_v8  ;;  %vm145_vm7 = vcmp.lt.s32.totalorder %v109_v7, %v522_v8  ;;  %vm146_vm10 = vcmp.lt.s32.totalorder %v110_v9, %v522_v8 }
  0x14   :  { %vm163_vm5 = vmand %vm130_vm1, %vm147_vm3  ;;  %vm143_vm14 = vcmp.lt.s32.totalorder %v107_v10, %v522_v8  ;;  %vm144_vm1 = vcmp.lt.s32.totalorder %v108_v11, %v522_v8  ;;  %v103_v16 = vadd.s32 48, %v511_v2  ;;  %v104_v18 = vadd.s32 56, %v511_v2  ;;  %p464_p8 = por %p463_p7, %p462_p6 }
  0x15   :  { %vm164_vm8 = vmand %vm131_vm2, %vm148_vm4  ;;  %vm124_vm4 = vcmp.ge.s32.totalorder %v105_v12, %v517_v6  ;;  %v101_v22 = vadd.s32 32, %v511_v2  ;;  %v102_v24 = vadd.s32 40, %v511_v2  ;;  %v193_v26 = vsub.f32 %v192_v21, %v191_v20 }
  0x16   :  { %vm340_vm11 = vmpackc.low %vm164_vm8, %vm163_vm5  ;;  %vm141_vm5 = vcmp.lt.s32.totalorder %v105_v12, %v522_v8  ;;  %vm142_vm8 = vcmp.lt.s32.totalorder %v106_v15, %v522_v8  ;;  %v99_v28 = vadd.s32 16, %v511_v2  ;;  %v100_v30 = vadd.s32 24, %v511_v2  ;;  %p465_p9 = pnand %p464_p8, %p458_p5 }
  0x17   :  { %391 = vmatpush3.bf16.msk.msra.mxu0 %vm340_vm11, %v484_v13  ;;  %411 = vmatpush3.bf16.msk.msra.mxu1 %vm340_vm11, %v484_v13  ;;  %vm537_vm12 = vmand %vm128_vm6, %vm145_vm7  ;;  %vm125_vm7 = vcmp.ge.s32.totalorder %v106_v15, %v517_v6  ;;  %vm122_vm11 = vcmp.ge.s32.totalorder %v103_v16, %v517_v6  ;;  %v194_v31 = vmul.f32 %v193_v26, %v193_v26  ;;  %v98_v34 = vadd.s32 8, %v511_v2 }
  0x18   :  { %392 = vmatprep.subr.bf16.mxu0 %v482_v1  ;;  %412 = vmatprep.subr.bf16.mxu1 %v482_v1  ;;  %vm162_vm15 = vmand %vm129_vm9, %vm146_vm10  ;;  %v283_v48 = vsub.f32 1.0, %v279_v44 }
  0x19   :  { %vm342_vm2 = vmpackc.low %vm162_vm15, %vm537_vm12  ;;  %vm139_vm12 = vcmp.lt.s32.totalorder %v103_v16, %v522_v8  ;;  %vm140_vm15 = vcmp.lt.s32.totalorder %v104_v18, %v522_v8  ;;  %v195_v35 = vpack.c.bf16 %v194_v31, %v194_v31 }
  0x1a   :  { %vm551_vm3 = vmand %vm126_vm13, %vm143_vm14  ;;  %vm123_vm14 = vcmp.ge.s32.totalorder %v104_v18, %v517_v6 }
  0x1b   :  { %393 = vmatpush3.bf16.msk.msra.mxu0 %vm342_vm2, %v484_v13  ;;  %413 = vmatpush3.bf16.msk.msra.mxu1 %vm342_vm2, %v484_v13  ;;  %vm560_vm6 = vmand %vm127_vm0, %vm144_vm1  ;;  %vm120_vm2 = vcmp.ge.s32.totalorder %v101_v22, %v517_v6  ;;  %v196_v38 = vunpack.c.l.bf16 %v195_v35 }
  0x1c   :  { %394 = vmatprep.subr.bf16.mxu0 %v482_v1  ;;  %414 = vmatprep.subr.bf16.mxu1 %v482_v1  ;;  %vm344_vm9 = vmpackc.low %vm560_vm6, %vm551_vm3  ;;  %vm137_vm3 = vcmp.lt.s32.totalorder %v101_v22, %v522_v8  ;;  %vm138_vm6 = vcmp.lt.s32.totalorder %v102_v24, %v522_v8 }
  0x1d   :  { %vm576_vm10 = vmand %vm124_vm4, %vm141_vm5  ;;  %vm121_vm5 = vcmp.ge.s32.totalorder %v102_v24, %v517_v6  ;;  %v197_v39 = vsub.f32 %v194_v31, %v196_v38 }
  0x1e   :  { %vm583_vm13 = vmand %vm125_vm7, %vm142_vm8 }
  0x1f   :  { %395 = vmatpush3.bf16.msk.msra.mxu0 %vm344_vm9, %v484_v13  ;;  %415 = vmatpush3.bf16.msk.msra.mxu1 %vm344_vm9, %v484_v13  ;;  %vm346_vm0 = vmpackc.low %vm583_vm13, %vm576_vm10  ;;  %vm118_vm10 = vcmp.ge.s32.totalorder %v99_v28, %v517_v6  ;;  %vm136_vm13 = vcmp.lt.s32.totalorder %v100_v30, %v522_v8  ;;  %v198_v40 = vpack.c.bf16 %v197_v39, %v197_v39 }
  0x20   :  { %396 = vmatprep.subr.bf16.mxu0 %v482_v1  ;;  %416 = vmatprep.subr.bf16.mxu1 %v482_v1  ;;  %vm597_vm1 = vmand %vm122_vm11, %vm139_vm12  ;;  %vm135_vm11 = vcmp.lt.s32.totalorder %v99_v28, %v522_v8  ;;  %vm119_vm12 = vcmp.ge.s32.totalorder %v100_v30, %v517_v6 }
  0x21   :  { %vm604_vm4 = vmand %vm123_vm14, %vm140_vm15 }
  0x22   :  { %vm348_vm7 = vmpackc.low %vm604_vm4, %vm597_vm1  ;;  %vm117_vm1 = vcmp.ge.s32.totalorder %v98_v34, %v517_v6  ;;  %vm134_vm4 = vcmp.lt.s32.totalorder %v98_v34, %v522_v8 }
  0x23   :  { %397 = vmatpush3.bf16.msk.msra.mxu0 %vm346_vm0, %v484_v13  ;;  %417 = vmatpush3.bf16.msk.msra.mxu1 %vm346_vm0, %v484_v13  ;;  %vm617_vm8 = vmand %vm120_vm2, %vm137_vm3  ;;  %vm116_vm2 = vcmp.ge.s32.totalorder %v511_v2, %v517_v6  ;;  %vm133_vm3 = vcmp.lt.s32.totalorder %v511_v2, %v522_v8 }
  0x24   :  { %398 = vmatprep.subr.bf16.mxu0 %v482_v1  ;;  %418 = vmatprep.subr.bf16.mxu1 %v482_v1  ;;  %vm623_vm9 = vmand %vm121_vm5, %vm138_vm6 }
  0x25   :  { %vm350_vm14 = vmpackc.low %vm623_vm9, %vm617_vm8  ;;  %vm94_vm9 = vcmask 31744  }
  0x26   :  { %vm648_vm15 = vmand %vm118_vm10, %vm135_vm11  ;;  %95 = vst.msk [vmem:[#allocation2] sm:$0xff] %vm94_vm9, %v482_v1  ;;  %vm289_vm10 = vcmp.lt.s32.totalorder %v511_v2, 2 }
  0x27   :  { %399 = vmatpush3.bf16.msk.msra.mxu0 %vm348_vm7, %v484_v13  ;;  %419 = vmatpush3.bf16.msk.msra.mxu1 %vm348_vm7, %v484_v13  ;;  %vm654_vm0 = vmand %vm119_vm12, %vm136_vm13 }
  0x28   :  { %400 = vmatprep.subr.bf16.mxu0 %v482_v1  ;;  %420 = vmatprep.subr.bf16.mxu1 %v482_v1  ;;  %vm352_vm5 = vmpackc.low %vm654_vm0, %vm648_vm15 }
  0x29   :  { %vm149_vm6 = vmand %vm116_vm2, %vm133_vm3 }
  0x2a   :  { %vm150_vm7 = vmand %vm117_vm1, %vm134_vm4 }
  0x2b   :  { %401 = vmatpush3.bf16.msk.msra.mxu0 %vm350_vm14, %v484_v13  ;;  %421 = vmatpush3.bf16.msk.msra.mxu1 %vm350_vm14, %v484_v13  ;;  %vm354_vm8 = vmpackc.low %vm150_vm7, %vm149_vm6 }
  0x2c   :  { %402 = vmatprep.subr.bf16.mxu0 %v482_v1  ;;  %422 = vmatprep.subr.bf16.mxu1 %v482_v1 }
  0x2d   :  { %v291_v58 = vld [vmem:[#allocation2] sm:$0xff] }
  0x2f   :  { %403 = vmatpush3.bf16.msk.msra.mxu0 %vm352_vm5, %v484_v13  ;;  %423 = vmatpush3.bf16.msk.msra.mxu1 %vm352_vm5, %v484_v13 }
  0x30   :  { %404 = vmatprep.subr.bf16.mxu0 %v482_v1  ;;  %424 = vmatprep.subr.bf16.mxu1 %v482_v1 }
  0x33   :  { %405 = vmatpush3.bf16.msk.msra.mxu0 %vm354_vm8, %v484_v13  ;;  %425 = vmatpush3.bf16.msk.msra.mxu1 %vm354_vm8, %v484_v13 }
  0x36   :  { %407 = vmatmul.mubr.bf16.vlgmr.msra.gmra.mxu0 %v198_v40  ;;  %427 = vmatmul.mubr.bf16.vlgmr.msra.gmra.mxu1 %v195_v35 }
  0xf6   :  { %v233_v41 = vpop.f32.mrf.mxu0  ;;  %v273_v42 = vpop.f32.mrf.mxu1 }
  0xf7   :  { %v274_v43 = vadd.f32 %v273_v42, %v233_v41 }
  0xf8   :  { %v408_v45 = vpop.f32.mrf.mxu0  ;;  %v428_v46 = vpop.f32.mrf.mxu1 }
  0xf9   :  { %v280_v47 = vsub.f32 0.7, %v274_v43  ;;  %v282_v54 = vmul.f32 %v279_v44, %v274_v43 }
  0xfa   :  { %v236_v49 = vpop.f32.mrf.mxu0  ;;  %v276_v50 = vpop.f32.mrf.mxu1 }
  0xfb   :  { %v281_v51 = vmax.f32 %v280_v47, 0.0 }
  0xfc   :  { %v409_v52 = vpop.f32.mrf.mxu0  ;;  %v429_v53 = vpop.f32.mrf.mxu1 }
  0xfd   :  { %v284_v55 = vmul.f32 %v283_v48, %v281_v51 }
  0xff   :  { %v285_v56 = vadd.f32 %v284_v55, %v282_v54 }
 0x101   :  { %v286_v57 = vmul.f32 0.5, %v285_v56 }
 0x103   :  { %v290_v59 = vsel %vm289_vm10, %v286_v57, 0.0 }
 0x104   :  { %v292_v60 = vadd.f32 %v291_v58, %v290_v59 }
 0x106   :  { %294 = vst.msk [vmem:[#allocation2] sm:$0xff] %vm94_vm9, %v292_v60 }
 0x10d   :  { %v298_v61 = vld [vmem:[#allocation2] sm:$0xff] }
 0x10e   :  { %v299_v62 = vsel %vm94_vm9, %v298_v61, 0.0 }
 0x10f   :  { %300 = vadd.xlane.f32.xlu0 %v299_v62 }
 0x198   :  { %v301_v63 = vpop.xlane.xlu0 %300 }
 0x199   :  { %v302_v0 = vrot.slane %v301_v63, 4 }
 0x19b   :  { %v303_v1 = vadd.f32 %v302_v0, %v301_v63 }
 0x19d   :  { %v304_v3 = vrot.slane %v303_v1, 2 }
 0x19f   :  { %v305_v4 = vadd.f32 %v304_v3, %v303_v1 }
 0x1a1   :  { %v306_v5 = vrot.slane %v305_v4, 1 }
 0x1a3   :  { %v307_v6 = vadd.f32 %v306_v5, %v305_v4 }
 0x1a5   :  { %430 = vpush %v307_v6 }
 0x1d6   :  { %s431_s20 = spop %430 }
 0x1d7   :  { %v309_v2 = vstv %s431_s20 }
 0x1d8   :  { %310 = vst [vmem:[#allocation6] sm:$0xff] %v309_v2 }
 0x1d9   :  { %468 = shalt.err (!%p465_p9)
}
 0x1da   :  { %320 = dma.vmem_to_hbm [thread:$0]  %s318_s19, 128, %s692_s3, [#allocation5]  }
 0x1db   :  { %479 = dma.done.wait [#allocation5], 128  }
 0x1dc   :  { %480 = vsyncadd [#allocation5], 4294967168 }
 0x1dd   :  { %324 = vsyncpa [#allocation4], 1 }
 0x1de   :  { %325 = vsyncpa [#allocation5], 1 }

</bundles_post_ra>
